<compile_context>
chip_gen: v6e
topology: v6e:2x2x1
jax: 0.10.0
libtpu: 0.0.40
codegen_flags: <defaults>
</compile_context>

<pallas_src>
import functools

import numpy as np
import jax
import jax.numpy as jnp
from jax.experimental import pallas as pl
from jax.experimental.pallas import tpu as pltpu

_CHUNK_IN = 256      # input lanes per chunk row
_CHUNK_OUT = 128     # output lanes per chunk row
_SUB = 16            # sublane alignment (covers f32 (8,128) and bf16 (16,128) tiles)
_TARGET_BLOCK_BYTES = 3 * 1024 * 1024   # ~3 MiB in+out per block (~6 MiB double-buffered)
_MIN_GRID_STEPS = 8  # >= 4 steps per TensorCore on v7x + real double-buffer overlap


def _build_filter():
    """(256, 128) decimation filter, exact in bf16: col n has 0.5 at row 2n, 0.25 at 2n+/-1."""
    r = np.arange(_CHUNK_IN)[:, None]
    c = np.arange(_CHUNK_OUT)[None, :]
    f = 0.5 * (r == 2 * c) + 0.25 * (r == 2 * c + 1) + 0.25 * (r == 2 * c - 1)
    return jnp.asarray(f, dtype=jnp.bfloat16)


def _choose_tm(m, dtype_bytes):
    """Chunk rows per block: byte-bounded, >= _MIN_GRID_STEPS grid steps, _SUB-aligned."""
    row_bytes = (_CHUNK_IN + _CHUNK_OUT) * dtype_bytes
    target = max(_SUB, _TARGET_BLOCK_BYTES // row_bytes)
    tm = min(target, max(_SUB, pl.cdiv(m, _MIN_GRID_STEPS)))
    tm = max(_SUB, (tm // _SUB) * _SUB)
    if tm >= m:
        return m           # single block; a full-extent block dim is always legal
    return tm


def _aadown_kernel(x_ref, prev_ref, w_ref, o_ref, *, cpr):
    x = x_ref[...]          # (TM, 256) in input dtype
    w = w_ref[...]          # (256, 128) bf16, resident across grid steps
    tm = x.shape[0]

    # Stride-2 decimation on the MXU.  For f32 inputs split into two bf16 halves:
    # the filter is exact in bf16, so two bf16 passes give ~f32 accuracy at a
    # fraction of Precision.HIGHEST's MXU cost; bf16 inputs use a single pass.
    if x.dtype == jnp.float32:
        x_hi = x.astype(jnp.bfloat16)
        x_lo = (x - x_hi.astype(jnp.float32)).astype(jnp.bfloat16)
        acc = (jnp.dot(x_hi, w, preferred_element_type=jnp.float32)
               + jnp.dot(x_lo, w, preferred_element_type=jnp.float32))
    else:
        acc = jnp.dot(x, w, preferred_element_type=jnp.float32)

    # Left tap of output lane 0 of every chunk row:
    #   0.25 * x[previous chunk row, 255]   (same (b, c) row), or
    #   0.25 * x[this chunk row, 1]         (reflect) at each (b, c) row start.
    last_col = x[:, _CHUNK_IN - 1:_CHUNK_IN]                    # (TM, 1)
    prev = pltpu.roll(last_col, shift=1, axis=0)                # row r <- row r-1 tail
    row_id = jax.lax.broadcasted_iota(jnp.int32, (tm, 1), 0)
    prev_tail = prev_ref[prev_ref.shape[0] - 1:prev_ref.shape[0],
                         _CHUNK_IN - 1:_CHUNK_IN]               # (1,1) tail of previous block
    prev = jnp.where(row_id == 0, prev_tail, prev)              # cross-block fix for row 0
    g_row = pl.program_id(0) * tm + row_id                      # global chunk-row index
    is_row_start = (g_row % cpr) == 0
    left = jnp.where(is_row_start, x[:, 1:2], prev).astype(jnp.float32)

    lane0 = jax.lax.broadcasted_iota(jnp.int32, (1, _CHUNK_OUT), 1) == 0
    acc = jnp.where(lane0, acc + 0.25 * left, acc)
    o_ref[...] = acc.astype(o_ref.dtype)


def aa_downsample(x):
    """Anti-aliased downsample matching AADownsample(filt_size=3, stride=2).

    x: (B, C, L), L >= 2, float32 or bfloat16.  Returns (B, C, ceil(L / 2))."""
    B, C, L = x.shape
    assert L >= 2, "reflect padding needs L >= 2"
    if x.dtype not in (jnp.float32, jnp.bfloat16):
        x = x.astype(jnp.float32)

    if L % 2:
        # TODO(synk): compute the odd-L right-reflect output column in-kernel instead of this copy.
        x = jnp.concatenate([x, x[:, :, L - 2:L - 1]], axis=-1)
        L += 1
    l_out = L // 2

    l_pad = pl.cdiv(L, _CHUNK_IN) * _CHUNK_IN
    if l_pad != L:
        # TODO(synk): handle the ragged tail chunk in-kernel (masked edge fill) to avoid this
        # extra HBM pass; the main (L % 256 == 0) path below is zero-copy.
        x = jnp.pad(x, ((0, 0), (0, 0), (0, l_pad - L)), mode="edge")

    rows = B * C
    cpr = l_pad // _CHUNK_IN               # chunk rows per original (b, c) row
    m = rows * cpr
    dtype_bytes = x.dtype.itemsize
    tm = _choose_tm(m, dtype_bytes)
    grid = (pl.cdiv(m, tm),)
    prev_sub = min(_SUB, m)

    x2 = x.reshape(m, _CHUNK_IN)           # free view of the contiguous (B, C, L) buffer
    filt = _build_filter()
    passes = 2 if x.dtype == jnp.float32 else 1

    out2 = pl.pallas_call(
        functools.partial(_aadown_kernel, cpr=cpr),
        out_shape=jax.ShapeDtypeStruct((m, _CHUNK_OUT), x.dtype),
        grid=grid,
        in_specs=[
            pl.BlockSpec((tm, _CHUNK_IN), lambda i: (i, 0)),
            # Tail chunk rows of the previous block: supply the cross-block
            # "previous chunk tail" for output lane 0 of this block's first row.
            pl.BlockSpec((prev_sub, _CHUNK_IN),
                         lambda i: (jnp.maximum(i * (tm // prev_sub) - 1, 0), 0)),
            # Decimation filter: constant block index -> stays resident in VMEM.
            pl.BlockSpec((_CHUNK_IN, _CHUNK_OUT), lambda i: (0, 0)),
        ],
        out_specs=pl.BlockSpec((tm, _CHUNK_OUT), lambda i: (i, 0)),
        compiler_params=pltpu.CompilerParams(
            dimension_semantics=("parallel",),
            vmem_limit_bytes=32 * 1024 * 1024),
        cost_estimate=pl.CostEstimate(
            flops=2 * m * _CHUNK_IN * _CHUNK_OUT * passes,
            transcendentals=0,
            bytes_accessed=dtype_bytes * m * (_CHUNK_IN + _CHUNK_OUT)),
    )(x2, x2, filt)

    out = out2.reshape(B, C, l_pad // 2)   # free view back to (B, C, padded L_out)
    if l_pad != L:
        out = out[:, :, :l_out]
    return out


def reference(x):
    """Pure-JAX reference of F.pad(reflect) + depthwise conv1d(stride=2)."""
    a = jnp.array([0.25, 0.5, 0.25], jnp.float32)
    xp = jnp.pad(x, ((0, 0), (0, 0), (1, 1)), mode="reflect")
    l_out = (xp.shape[-1] - 3) // 2 + 1
    out = jnp.zeros((x.shape[0], x.shape[1], l_out), jnp.float32)
    for k in range(3):
        out = out + a[k] * xp[:, :, k:k + 2 * l_out:2]
    return out


if __name__ == "__main__":
    key = jax.random.PRNGKey(0)
    # (tiny module-sized, odd-L reflect, mid-row block splits + partial last block,
    #  multi-step pipelined grid)
    f32_shapes = [(2, 4, 16), (1, 3, 15), (1, 5, 6144), (2, 8, 16384)]
    for (B, C, L) in f32_shapes:
        key, sub = jax.random.split(key)
        x = jax.random.normal(sub, (B, C, L), dtype=jnp.float32)
        y = jax.block_until_ready(aa_downsample(x))
        y_ref = reference(x)
        assert y.shape == y_ref.shape, (y.shape, y_ref.shape)
        assert jnp.allclose(y, y_ref, atol=1e-4, rtol=1e-4), f"f32 mismatch for {(B, C, L)}"

    # Native bf16 path (halved HBM traffic, single MXU pass).
    key, sub = jax.random.split(key)
    xb = jax.random.normal(sub, (1, 16, 512), dtype=jnp.float32).astype(jnp.bfloat16)
    yb = jax.block_until_ready(aa_downsample(xb))
    yb_ref = reference(xb.astype(jnp.float32))
    assert yb.shape == yb_ref.shape, (yb.shape, yb_ref.shape)
    assert jnp.allclose(yb.astype(jnp.float32), yb_ref, atol=5e-2, rtol=5e-2), "bf16 mismatch"

    print("KERNEL_OK")
</pallas_src>

<mosaic_0001>
module attributes {stable_mosaic.version = 11 : i64} {
  func.func @_aadown_kernel(%arg0: i32, %arg1: memref<8x256xf32, #tpu.memory_space<vmem>>, %arg2: memref<8x256xf32, #tpu.memory_space<vmem>>, %arg3: memref<256x128xbf16, #tpu.memory_space<vmem>>, %arg4: memref<8x128xf32, #tpu.memory_space<vmem>>) attributes {dimension_semantics = [#tpu.dimension_semantics<parallel>], iteration_bounds = array<i64: 1>, scalar_prefetch = 0 : i64, scratch_operands = 0 : i64, tpu.core_type = #tpu.core_type<tc>, window_params = [{transform_indices = @transform_0, window_bounds = array<i64: 8, 256>}, {transform_indices = @transform_1, window_bounds = array<i64: 8, 256>}, {pipeline_mode = #tpu.pipeline_mode<synchronous>, transform_indices = @transform_2, window_bounds = array<i64: 256, 128>}, {transform_indices = @transform_3, window_bounds = array<i64: 8, 128>}]} {
    %c0 = arith.constant 0 : index
    %c0_0 = arith.constant 0 : index
    %0 = vector.load %arg1[%c0, %c0_0] : memref<8x256xf32, #tpu.memory_space<vmem>>, vector<8x256xf32>
    %c0_1 = arith.constant 0 : index
    %c0_2 = arith.constant 0 : index
    %1 = vector.load %arg3[%c0_1, %c0_2] : memref<256x128xbf16, #tpu.memory_space<vmem>>, vector<256x128xbf16>
    %2 = arith.truncf %0 : vector<8x256xf32> to vector<8x256xbf16>
    %3 = arith.extf %2 : vector<8x256xbf16> to vector<8x256xf32>
    %4 = arith.subf %0, %3 : vector<8x256xf32>
    %5 = arith.truncf %4 : vector<8x256xf32> to vector<8x256xbf16>
    %cst = arith.constant dense<0.000000e+00> : vector<8x128xf32>
    %6 = tpu.matmul %2, %1, %cst {dimension_numbers = #tpu.dot_dimension_numbers<[1], [0], [0], [1], [0, 0, 1, 1], [], []>} : vector<8x256xbf16>, vector<256x128xbf16>, vector<8x128xf32> -> vector<8x128xf32>
    %cst_3 = arith.constant dense<0.000000e+00> : vector<8x128xf32>
    %7 = tpu.matmul %5, %1, %cst_3 {dimension_numbers = #tpu.dot_dimension_numbers<[1], [0], [0], [1], [0, 0, 1, 1], [], []>} : vector<8x256xbf16>, vector<256x128xbf16>, vector<8x128xf32> -> vector<8x128xf32>
    %8 = arith.addf %6, %7 : vector<8x128xf32>
    %9 = vector.extract_strided_slice %0 {offsets = [0, 255], sizes = [8, 1], strides = [1, 1]} : vector<8x256xf32> to vector<8x1xf32>
    %c1_i32 = arith.constant 1 : i32
    %10 = tpu.dynamic_rotate %9 by %c1_i32 dim 0 : vector<8x1xf32>, i32 -> vector<8x1xf32>
    %11 = tpu.iota {dimensions = array<i32: 0>} : vector<8x1xi32>
    %c7 = arith.constant 7 : index
    %c255 = arith.constant 255 : index
    %12 = vector.load %arg2[%c7, %c255] : memref<8x256xf32, #tpu.memory_space<vmem>>, vector<1x1xf32>
    %c0_i32 = arith.constant 0 : i32
    %13 = vector.broadcast %c0_i32 : i32 to vector<8x1xi32>
    %14 = arith.cmpi eq, %11, %13 : vector<8x1xi32>
    %15 = vector.shape_cast %12 : vector<1x1xf32> to vector<1x1xf32>
    %16 = vector.broadcast %15 : vector<1x1xf32> to vector<8x1xf32>
    %17 = arith.select %14, %16, %10 : vector<8x1xi1>, vector<8x1xf32>
    %c8_i32 = arith.constant 8 : i32
    %18 = arith.muli %arg0, %c8_i32 : i32
    %19 = vector.broadcast %18 : i32 to vector<8x1xi32>
    %20 = arith.addi %19, %11 : vector<8x1xi32>
    %c1_i32_4 = arith.constant 1 : i32
    %c0_i32_5 = arith.constant 0 : i32
    %21 = arith.cmpi eq, %c1_i32_4, %c0_i32_5 : i32
    %c1_i32_6 = arith.constant 1 : i32
    %22 = arith.select %21, %c1_i32_6, %c1_i32_4 : i32
    %23 = vector.broadcast %22 : i32 to vector<8x1xi32>
    %24 = arith.remsi %20, %23 : vector<8x1xi32>
    %c0_i32_7 = arith.constant 0 : i32
    %25 = vector.broadcast %c0_i32_7 : i32 to vector<8x1xi32>
    %26 = arith.cmpi ne, %24, %25 : vector<8x1xi32>
    %c0_i32_8 = arith.constant 0 : i32
    %27 = vector.broadcast %c0_i32_8 : i32 to vector<8x1xi32>
    %28 = arith.cmpi slt, %24, %27 : vector<8x1xi32>
    %c0_i32_9 = arith.constant 0 : i32
    %29 = arith.cmpi slt, %22, %c0_i32_9 : i32
    %30 = vector.broadcast %29 : i1 to vector<8x1xi1>
    %31 = vector.broadcast %30 : vector<8x1xi1> to vector<8x1xi1>
    %32 = arith.xori %28, %31 : vector<8x1xi1>
    %33 = arith.andi %32, %26 : vector<8x1xi1>
    %34 = vector.broadcast %22 : i32 to vector<8x1xi32>
    %35 = arith.addi %24, %34 : vector<8x1xi32>
    %36 = arith.select %33, %35, %24 : vector<8x1xi1>, vector<8x1xi32>
    %c0_i32_10 = arith.constant 0 : i32
    %37 = vector.broadcast %c0_i32_10 : i32 to vector<8x1xi32>
    %38 = arith.cmpi eq, %36, %37 : vector<8x1xi32>
    %39 = vector.extract_strided_slice %0 {offsets = [0, 1], sizes = [8, 1], strides = [1, 1]} : vector<8x256xf32> to vector<8x1xf32>
    %40 = arith.select %38, %39, %17 : vector<8x1xi1>, vector<8x1xf32>
    %41 = tpu.iota {dimensions = array<i32: 1>} : vector<1x128xi32>
    %c0_i32_11 = arith.constant 0 : i32
    %42 = vector.broadcast %c0_i32_11 : i32 to vector<1x128xi32>
    %43 = arith.cmpi eq, %41, %42 : vector<1x128xi32>
    %cst_12 = arith.constant 2.500000e-01 : f32
    %44 = vector.broadcast %cst_12 : f32 to vector<8x1xf32>
    %45 = arith.mulf %44, %40 : vector<8x1xf32>
    %46 = vector.broadcast %45 : vector<8x1xf32> to vector<8x128xf32>
    %47 = arith.addf %8, %46 : vector<8x128xf32>
    %48 = vector.shape_cast %43 : vector<1x128xi1> to vector<1x128xi1>
    %49 = vector.broadcast %48 : vector<1x128xi1> to vector<8x128xi1>
    %50 = arith.select %49, %47, %8 : vector<8x128xi1>, vector<8x128xf32>
    %c0_13 = arith.constant 0 : index
    %c0_14 = arith.constant 0 : index
    %51 = vector.load %arg4[%c0_13, %c0_14] : memref<8x128xf32, #tpu.memory_space<vmem>>, vector<8x128xf32>
    tpu.vector_store %arg4[%c0_13, %c0_14], %50 {strides = array<i32>} : memref<8x128xf32, #tpu.memory_space<vmem>>, vector<8x128xf32>,
    return
  }
  func.func @transform_0(%arg0: i32) -> (i32, i32) {
    %c0_i32 = arith.constant 0 : i32
    %c0_i32_0 = arith.constant 0 : i32
    return %arg0, %c0_i32 : i32, i32
  }
  func.func @transform_1(%arg0: i32) -> (i32, i32) {
    %c1_i32 = arith.constant 1 : i32
    %0 = arith.muli %arg0, %c1_i32 : i32
    %c1_i32_0 = arith.constant 1 : i32
    %1 = arith.subi %0, %c1_i32_0 : i32
    %c0_i32 = arith.constant 0 : i32
    %2 = arith.maxsi %1, %c0_i32 : i32
    %c0_i32_1 = arith.constant 0 : i32
    %c0_i32_2 = arith.constant 0 : i32
    return %2, %c0_i32_1 : i32, i32
  }
  func.func @transform_2(%arg0: i32) -> (i32, i32) {
    %c0_i32 = arith.constant 0 : i32
    %c0_i32_0 = arith.constant 0 : i32
    %c0_i32_1 = arith.constant 0 : i32
    return %c0_i32, %c0_i32_0 : i32, i32
  }
  func.func @transform_3(%arg0: i32) -> (i32, i32) {
    %c0_i32 = arith.constant 0 : i32
    %c0_i32_0 = arith.constant 0 : i32
    return %arg0, %c0_i32 : i32, i32
  }
}

</mosaic_0001>

<bundles_post_ra>
// kernel: tpu_custom_call.1
= control target key start
LH: loop header
LB: loop body
LE: loop exit
PB: predicated region body
PF: predicated region fallthrough
CT: control target
= control target key end

     0   :  { %8 = vsyncpa [#allocation3], 0  ;;  %s521_s0 = inlined_call_operand.hbm [shape: f32[8,256], index: 0, kind: input, shape index: {}]   ;;  %s522_s1 = inlined_call_operand.hbm [shape: f32[8,256], index: 1, kind: input, shape index: {}]   ;;  %s523_s2 = inlined_call_operand.hbm [shape: bf16[256,128], index: 2, kind: input, shape index: {}]   ;;  %s524_s3 = inlined_call_operand.hbm [shape: f32[8,128], index: 3, kind: output, shape index: {}]  }
   0x1   :  { %9 = vsyncpa [#allocation6], 0 }
   0x2   :  { %10 = vsyncpa [#allocation4], 0  ;;  %s482_s12 = smov [#allocation5]   ;;  %s483_s14 = smov [#allocation2]  }
   0x3   :  { %s33_s13 = sshll.u32 %s482_s12, 4  ;;  %s17_s15 = sshll.u32 %s483_s14, 4  ;;  %s34_s13 = int_to_ptr.vmem [resolvable:$true] %s33_s13  ;;  %s18_s15 = int_to_ptr.vmem [resolvable:$true] %s17_s15 }
   0x4   :  { %s404_s16 = scalar_lea.vmem %s34_s13, 256  ;;  %p409_p1 = scmp.lt.s32.totalorder %s34_s13, %s34_s13 }
   0x5   :  { %p405_p0 = scmp.ne.s32.totalorder %s34_s13, %s404_s16  ;;  %p410_p2 = scmp.lt.s32.totalorder %s404_s16, %s404_s16 }
   0x7   :  { %p411_p3 = por %p410_p2, %p409_p1 }
   0x9   :  { %p412_p4 = pnand %p411_p3, %p405_p0 }
   0xb   :  { %415 = shalt.err (!%p412_p4)
}
   0xc   :  { %36 = dma.hbm_to_vmem [thread:$0]  %s522_s1, 256, %s34_s13, [#allocation6]  }
   0xd   :  { %s424_s19 = scalar_lea.vmem %s18_s15, 256  ;;  %p429_p6 = scmp.lt.s32.totalorder %s18_s15, %s18_s15 }
   0xe   :  { %p425_p5 = scmp.ne.s32.totalorder %s18_s15, %s424_s19  ;;  %p430_p7 = scmp.lt.s32.totalorder %s424_s19, %s424_s19 }
  0x10   :  { %p431_p8 = por %p430_p7, %p429_p6 }
  0x12   :  { %p432_p9 = pnand %p431_p8, %p425_p5 }
  0x14   :  { %435 = shalt.err (!%p432_p9)
}
  0x15   :  { %20 = dma.hbm_to_vmem [thread:$0]  %s521_s0, 256, %s18_s15, [#allocation3]  }
  0x16   :  { %s484_s22 = smov [#allocation7]  }
  0x17   :  { %s42_s23 = sshll.u32 %s484_s22, 4  ;;  %s43_s23 = int_to_ptr.vmem [resolvable:$true] %s42_s23 }
  0x18   :  { %s444_s24 = scalar_lea.vmem %s43_s23, 2048  ;;  %p449_p11 = scmp.lt.s32.totalorder %s43_s23, %s43_s23 }
  0x19   :  { %p445_p10 = scmp.ne.s32.totalorder %s43_s23, %s444_s24  ;;  %p450_p12 = scmp.lt.s32.totalorder %s444_s24, %s444_s24 }
  0x1b   :  { %p451_p13 = por %p450_p12, %p449_p11 }
  0x1d   :  { %p452_p0 = pnand %p451_p13, %p445_p10 }
  0x1f   :  { %455 = shalt.err (!%p452_p0)
}
  0x20   :  { %s485_s1 = smov 64   ;;  %s486_s25 = smov 4  }
  0x21   :  { %48 = dma.hbm_to_vmem [thread:$0]  %s523_s2, 2048, %s43_s23, [#allocation6], %s485_s1, %s485_s1, %s486_s25  }
  0x22   :  { %476 = dma.done.wait [#allocation3], 256  }
  0x23   :  { %477 = vsyncadd [#allocation3], 4294967040 }
  0x24   :  { %478 = dma.done.wait [#allocation6], 2304  }
  0x25   :  { %479 = vsyncadd [#allocation6], 4294964992  ;;  %v487_v0 = vmov 1   ;;  %v380_v1 = vld [vmem:[#allocation7 + $0x78] sm:$0xff]   ;;  %v382_v3 = vld [vmem:[#allocation7 + $0x70] sm:$0xff]   ;;  %v280_v28 = vlaneseq  ;;  %s488_s0 = smov [#allocation8]  }
  0x26   :  { %379 = vset.pattern.permute.xlu0 %v487_v0  ;;  %v381_v2 = vld [vmem:[#allocation7 + $0x38] sm:$0xff]   ;;  %328 = vmatprep.subr.bf16.mxu0 %v380_v1  ;;  %v383_v4 = vld [vmem:[#allocation7 + $0x30] sm:$0xff]   ;;  %v384_v5 = vld [vmem:[#allocation7 + $0x68] sm:$0xff]   ;;  %s300_s2 = sshll.u32 %s488_s0, 4  ;;  %s301_s2 = int_to_ptr.vmem [resolvable:$true] %s300_s2 }
  0x27   :  { %350 = vmatprep.subr.bf16.mxu1 %v380_v1  ;;  %329 = vmatpush3.bf16.msra.mxu0 %v381_v2  ;;  %v385_v6 = vld [vmem:[#allocation7 + $0x28] sm:$0xff]   ;;  %v386_v7 = vld [vmem:[#allocation7 + $0x60] sm:$0xff]   ;;  %v388_v9 = vld [vmem:[#allocation7 + $0x58] sm:$0xff]   ;;  %v281_v33 = vand.u32 127, %v280_v28  ;;  %s456_s28 = scalar_lea.vmem %s301_s2, 128  ;;  %p461_p2 = scmp.lt.s32.totalorder %s301_s2, %s301_s2 }
  0x28   :  { %351 = vmatpush3.bf16.msra.mxu1 %v381_v2  ;;  %330 = vmatprep.subr.bf16.mxu0 %v382_v3  ;;  %v387_v8 = vld [vmem:[#allocation7 + $0x20] sm:$0xff]   ;;  %v389_v10 = vld [vmem:[#allocation7 + $0x18] sm:$0xff]   ;;  %v390_v11 = vld [vmem:[#allocation7 + $0x50] sm:$0xff]   ;;  %p457_p1 = scmp.ne.s32.totalorder %s301_s2, %s456_s28  ;;  %p462_p3 = scmp.lt.s32.totalorder %s456_s28, %s456_s28 }
  0x29   :  { %352 = vmatprep.subr.bf16.mxu1 %v382_v3  ;;  %v63_v12 = vld [vmem:[#allocation2 + $0x8] sm:$0xff]  ;;  %v62_v13 = vld [vmem:[#allocation2] sm:$0xff]  ;;  %v391_v17 = vld [vmem:[#allocation7 + $0x10] sm:$0xff]   ;;  %vm282_vm0 = vcmp.eq.s32.totalorder %v281_v33, 0 }
  0x2a   :  { %v97_v14 = vpack.c.bf16 %v63_v12, %v63_v12  ;;  %v283_v15 = vmul.f32 0.25, %v62_v13  ;;  %v96_v16 = vpack.c.bf16 %v62_v13, %v62_v13  ;;  %v392_v19 = vld [vmem:[#allocation7 + $0x48] sm:$0xff]   ;;  %v394_v24 = vld [vmem:[#allocation7 + $0x40] sm:$0xff]   ;;  %p463_p4 = por %p462_p3, %p461_p2 }
  0x2b   :  { %331 = vmatpush3.bf16.msra.mxu0 %v383_v4  ;;  %v393_v22 = vld [vmem:[#allocation7 + $0x8] sm:$0xff]   ;;  %v395_v26 = vld [vmem:[#allocation7] sm:$0xff]  }
  0x2c   :  { %353 = vmatpush3.bf16.msra.mxu1 %v383_v4  ;;  %332 = vmatprep.subr.bf16.mxu0 %v384_v5  ;;  %v99_v18 = vunpack.c.l.bf16 %v97_v14  ;;  %v98_v21 = vunpack.c.l.bf16 %v96_v16  ;;  %p464_p5 = pnand %p463_p4, %p457_p1 }
  0x2d   :  { %354 = vmatprep.subr.bf16.mxu1 %v384_v5  ;;  %272 = vmatprep.mubr.bf16.mxu1 %v97_v14 }
  0x2e   :  { %v101_v20 = vsub.f32 %v63_v12, %v99_v18  ;;  %286 = vperm.xlu0 %379, %v283_v15   ;;  %v100_v25 = vsub.f32 %v62_v13, %v98_v21 }
  0x2f   :  { %333 = vmatpush3.bf16.msra.mxu0 %v385_v6 }
  0x30   :  { %355 = vmatpush3.bf16.msra.mxu1 %v385_v6  ;;  %334 = vmatprep.subr.bf16.mxu0 %v386_v7  ;;  %v103_v23 = vpack.c.bf16 %v101_v20, %v101_v20  ;;  %v102_v27 = vpack.c.bf16 %v100_v25, %v100_v25 }
  0x31   :  { %356 = vmatprep.subr.bf16.mxu1 %v386_v7 }
  0x32   :  { %232 = vmatprep.mubr.bf16.mxu0 %v103_v23 }
  0x33   :  { %335 = vmatpush3.bf16.msra.mxu0 %v387_v8 }
  0x34   :  { %357 = vmatpush3.bf16.msra.mxu1 %v387_v8  ;;  %336 = vmatprep.subr.bf16.mxu0 %v388_v9 }
  0x35   :  { %358 = vmatprep.subr.bf16.mxu1 %v388_v9 }
  0x37   :  { %337 = vmatpush3.bf16.msra.mxu0 %v389_v10 }
  0x38   :  { %359 = vmatpush3.bf16.msra.mxu1 %v389_v10  ;;  %338 = vmatprep.subr.bf16.mxu0 %v390_v11 }
  0x39   :  { %360 = vmatprep.subr.bf16.mxu1 %v390_v11 }
  0x3b   :  { %339 = vmatpush3.bf16.msra.mxu0 %v391_v17 }
  0x3c   :  { %361 = vmatpush3.bf16.msra.mxu1 %v391_v17  ;;  %340 = vmatprep.subr.bf16.mxu0 %v392_v19 }
  0x3d   :  { %362 = vmatprep.subr.bf16.mxu1 %v392_v19 }
  0x3f   :  { %341 = vmatpush3.bf16.msra.mxu0 %v393_v22 }
  0x40   :  { %363 = vmatpush3.bf16.msra.mxu1 %v393_v22  ;;  %342 = vmatprep.subr.bf16.mxu0 %v394_v24 }
  0x41   :  { %364 = vmatprep.subr.bf16.mxu1 %v394_v24 }
  0x43   :  { %343 = vmatpush3.bf16.msra.mxu0 %v395_v26 }
  0x44   :  { %365 = vmatpush3.bf16.msra.mxu1 %v395_v26 }
  0x46   :  { %233 = vmatmul.mubr.bf16.vlgmr.msra.gmra.mxu0 %v102_v27 }
  0x47   :  { %273 = vmatmul.mubr.bf16.vlgmr.msra.gmra.mxu1 %v96_v16 }
  0xa9   :  { %v287_v36 = vpop.permute.xlu0 %286 }
 0x106   :  { %v344_v29 = vpop.f32.mrf.mxu0 }
 0x107   :  { %v366_v30 = vpop.f32.mrf.mxu1 }
 0x108   :  { %v345_v31 = vpop.f32.mrf.mxu0 }
 0x109   :  { %v367_v32 = vpop.f32.mrf.mxu1  ;;  %v346_v34 = vadd.f32 %v345_v31, %v344_v29 }
 0x10a   :  { %v368_v35 = vadd.f32 %v367_v32, %v366_v30  ;;  %v347_v37 = vpop.f32.mrf.mxu0 }
 0x10b   :  { %v369_v38 = vpop.f32.mrf.mxu1 }
 0x10c   :  { %v275_v39 = vadd.f32 %v368_v35, %v346_v34  ;;  %v348_v40 = vpop.f32.mrf.mxu0 }
 0x10d   :  { %v370_v41 = vpop.f32.mrf.mxu1 }
 0x10e   :  { %v289_v42 = vadd.f32 %v287_v36, %v275_v39 }
 0x110   :  { %v292_v43 = vsel %vm282_vm0, %v289_v42, %v275_v39 }
 0x111   :  { %293 = vst [vmem:[#allocation8] sm:$0xff] %v292_v43 }
 0x112   :  { %467 = shalt.err (!%p464_p5)
}
 0x113   :  { %303 = dma.vmem_to_hbm [thread:$0]  %s301_s2, 128, %s524_s3, [#allocation4]  }
 0x114   :  { %480 = dma.done.wait [#allocation4], 128  }
 0x115   :  { %481 = vsyncadd [#allocation4], 4294967168 }
 0x116   :  { %307 = vsyncpa [#allocation3], 1 }
 0x117   :  { %308 = vsyncpa [#allocation6], 1 }
 0x118   :  { %309 = vsyncpa [#allocation4], 1 }

</bundles_post_ra>
